<compile_context>
chip_gen: v7x
topology: tpu7x:2x2x1
jax: 0.10.0
libtpu: 0.0.40
codegen_flags: <defaults>
</compile_context>

<pallas_src>
import jax
import jax.numpy as jnp
from jax.experimental import pallas as pl
from jax.experimental.pallas import tpu as pltpu

LANE = 128           # lane width: pad all output feature dims to this
TILE_M_MAX = 1024    # max row-tile size for the batch axis
N_OUT = 10           # true fc3 output width (sliced from the padded 128 lanes)
K_IN = 16 * 5 * 5    # 400


def _round_up(x, m):
    return (x + m - 1) // m * m


# ------------------------------ Pallas kernel ------------------------------

def _fused_mlp_kernel(x_ref, w1_ref, b1_ref, w2_ref, b2_ref, w3_ref, b3_ref,
                      o_ref):
    """relu(x@W1+b1) -> relu(.@W2+b2) -> .@W3+b3, all in VMEM/vregs.

    Dots run in bf16 on the MXU with f32 accumulation; bias add + ReLU stay in
    f32 (v5e has no bf16 VPU).
    """
    x = x_ref[...].astype(jnp.bfloat16)
    h = jnp.dot(x, w1_ref[...], preferred_element_type=jnp.float32)
    h = jnp.maximum(h + b1_ref[...], 0.0).astype(jnp.bfloat16)
    h = jnp.dot(h, w2_ref[...], preferred_element_type=jnp.float32)
    h = jnp.maximum(h + b2_ref[...], 0.0).astype(jnp.bfloat16)
    h = jnp.dot(h, w3_ref[...], preferred_element_type=jnp.float32)
    o_ref[...] = (h + b3_ref[...]).astype(o_ref.dtype)


# ------------------------------ param plumbing -----------------------------

def init_params(key):
    """PyTorch-style Linear init, PyTorch (out_features, in_features) layout."""
    def linear_init(k, out_f, in_f):
        kw, kb = jax.random.split(k)
        bound = 1.0 / jnp.sqrt(in_f)
        w = jax.random.uniform(kw, (out_f, in_f), jnp.float32, -bound, bound)
        b = jax.random.uniform(kb, (out_f,), jnp.float32, -bound, bound)
        return w, b

    k1, k2, k3 = jax.random.split(key, 3)
    return {
        "fc1": linear_init(k1, 120, K_IN),
        "fc2": linear_init(k2, 84, 120),
        "fc3": linear_init(k3, 10, 84),
    }


def prepare_params(params):
    """One-time layout/dtype transform (call OUTSIDE the jitted forward).

    torch (out,in) weights -> bf16 (in, out_padded) matmul matrices with the
    output dim zero-padded to 128 lanes; biases -> f32 (1, out_padded).
    Zero padding is exact: relu(0)=0 activations hit all-zero weight rows.
    """
    (w1, b1), (w2, b2), (w3, b3) = params["fc1"], params["fc2"], params["fc3"]
    h1 = _round_up(w1.shape[0], LANE)   # 120 -> 128
    h2 = _round_up(w2.shape[0], LANE)   # 84  -> 128
    no = _round_up(w3.shape[0], LANE)   # 10  -> 128

    w1m = jnp.zeros((w1.shape[1], h1), jnp.float32).at[:, :w1.shape[0]].set(w1.T)
    b1m = jnp.zeros((1, h1), jnp.float32).at[0, :b1.shape[0]].set(b1)
    w2m = jnp.zeros((h1, h2), jnp.float32).at[:w2.shape[1], :w2.shape[0]].set(w2.T)
    b2m = jnp.zeros((1, h2), jnp.float32).at[0, :b2.shape[0]].set(b2)
    w3m = jnp.zeros((h2, no), jnp.float32).at[:w3.shape[1], :w3.shape[0]].set(w3.T)
    b3m = jnp.zeros((1, no), jnp.float32).at[0, :b3.shape[0]].set(b3)
    return {
        "w1": w1m.astype(jnp.bfloat16), "b1": b1m,
        "w2": w2m.astype(jnp.bfloat16), "b2": b2m,
        "w3": w3m.astype(jnp.bfloat16), "b3": b3m,
    }


# --------------------------------- forward ---------------------------------

def cifar_server_forward(kp, x):
    """x: (B, 400) f32 -> logits (B, 10) f32."""
    B, K = x.shape
    # >=2 grid steps whenever B > 8 so v7x's two TensorCores both get work,
    # capped at TILE_M_MAX so per-step work amortizes the pipeline overhead.
    tile_m = min(TILE_M_MAX, max(8, _round_up(pl.cdiv(B, 2), 8)))
    grid_m = pl.cdiv(B, tile_m)

    H1 = kp["w1"].shape[1]
    H2 = kp["w2"].shape[1]
    NO = kp["w3"].shape[1]

    flops = 2 * B * (K * H1 + H1 * H2 + H2 * NO)
    bytes_accessed = (4 * B * K                              # x (f32 in HBM)
                      + 2 * (K * H1 + H1 * H2 + H2 * NO)     # bf16 weights
                      + 4 * (H1 + H2 + NO)                   # f32 biases
                      + 4 * B * NO)                          # f32 output

    out = pl.pallas_call(
        _fused_mlp_kernel,
        out_shape=jax.ShapeDtypeStruct((B, NO), x.dtype),
        grid=(grid_m,),
        in_specs=[
            pl.BlockSpec((tile_m, K), lambda i: (i, 0)),   # x row tile
            pl.BlockSpec((K, H1), lambda i: (0, 0)),       # W1 (pinned)
            pl.BlockSpec((1, H1), lambda i: (0, 0)),       # b1
            pl.BlockSpec((H1, H2), lambda i: (0, 0)),      # W2
            pl.BlockSpec((1, H2), lambda i: (0, 0)),       # b2
            pl.BlockSpec((H2, NO), lambda i: (0, 0)),      # W3
            pl.BlockSpec((1, NO), lambda i: (0, 0)),       # b3
        ],
        out_specs=pl.BlockSpec((tile_m, NO), lambda i: (i, 0)),
        compiler_params=pltpu.CompilerParams(
            dimension_semantics=("parallel",),   # shard row tiles across v7x TCs
            vmem_limit_bytes=32 * 1024 * 1024,
        ),
        cost_estimate=pl.CostEstimate(
            flops=flops, transcendentals=0, bytes_accessed=bytes_accessed),
    )(x, kp["w1"], kp["b1"], kp["w2"], kp["b2"], kp["w3"], kp["b3"])

    # Lane-dense 128-wide store in-kernel; cheap 128->10 slice here.
    return out[:, :N_OUT]


# -------------------------------- references --------------------------------

def reference_forward(params, x):
    """Pure-f32 JAX reference matching the PyTorch module exactly."""
    w1, b1 = params["fc1"]
    w2, b2 = params["fc2"]
    w3, b3 = params["fc3"]
    h = jnp.maximum(x @ w1.T + b1, 0.0)
    h = jnp.maximum(h @ w2.T + b2, 0.0)
    return h @ w3.T + b3


def reference_forward_bf16(params, x):
    """Reference with the same bf16-input / f32-accumulate math as the kernel."""
    bf = jnp.bfloat16
    w1, b1 = params["fc1"]
    w2, b2 = params["fc2"]
    w3, b3 = params["fc3"]
    h = jnp.dot(x.astype(bf), w1.T.astype(bf),
                preferred_element_type=jnp.float32) + b1
    h = jnp.maximum(h, 0.0)
    h = jnp.dot(h.astype(bf), w2.T.astype(bf),
                preferred_element_type=jnp.float32) + b2
    h = jnp.maximum(h, 0.0)
    return jnp.dot(h.astype(bf), w3.T.astype(bf),
                   preferred_element_type=jnp.float32) + b3


if __name__ == "__main__":
    key = jax.random.PRNGKey(0)
    pkey, xkey = jax.random.split(key)

    params = init_params(pkey)
    kparams = prepare_params(params)   # one-time layout/dtype transform

    x = jax.random.normal(xkey, (2, K_IN), dtype=jnp.float32)

    out = jax.jit(cifar_server_forward)(kparams, x)
    out = jax.block_until_ready(out)

    assert out.shape == (2, N_OUT) and out.dtype == jnp.float32

    # Tight check vs. a reference using identical bf16/f32 mixed precision.
    ref_bf16 = reference_forward_bf16(params, x)
    assert jnp.allclose(out, ref_bf16, atol=1e-3, rtol=1e-3)

    # Loose check vs. the pure-f32 PyTorch-equivalent reference (bf16 weights
    # introduce ~0.4% relative quantization error).
    ref_f32 = reference_forward(params, x)
    assert jnp.allclose(out, ref_f32, atol=5e-2, rtol=5e-2)

    print("KERNEL_OK")
</pallas_src>

<mosaic_0001>
module attributes {stable_mosaic.version = 11 : i64} {
  func.func @_fused_mlp_kernel(%arg0: i32, %arg1: memref<8x400xf32, #tpu.memory_space<vmem>>, %arg2: memref<400x128xbf16, #tpu.memory_space<vmem>>, %arg3: memref<1x128xf32, #tpu.memory_space<vmem>>, %arg4: memref<128x128xbf16, #tpu.memory_space<vmem>>, %arg5: memref<1x128xf32, #tpu.memory_space<vmem>>, %arg6: memref<128x128xbf16, #tpu.memory_space<vmem>>, %arg7: memref<1x128xf32, #tpu.memory_space<vmem>>, %arg8: memref<8x128xf32, #tpu.memory_space<vmem>>) attributes {dimension_semantics = [#tpu.dimension_semantics<parallel>], iteration_bounds = array<i64: 1>, scalar_prefetch = 0 : i64, scratch_operands = 0 : i64, tpu.core_type = #tpu.core_type<tc>, window_params = [{transform_indices = @transform_0, window_bounds = array<i64: 8, 400>}, {pipeline_mode = #tpu.pipeline_mode<synchronous>, transform_indices = @transform_1, window_bounds = array<i64: 400, 128>}, {pipeline_mode = #tpu.pipeline_mode<synchronous>, transform_indices = @transform_2, window_bounds = array<i64: 1, 128>}, {pipeline_mode = #tpu.pipeline_mode<synchronous>, transform_indices = @transform_3, window_bounds = array<i64: 128, 128>}, {pipeline_mode = #tpu.pipeline_mode<synchronous>, transform_indices = @transform_4, window_bounds = array<i64: 1, 128>}, {pipeline_mode = #tpu.pipeline_mode<synchronous>, transform_indices = @transform_5, window_bounds = array<i64: 128, 128>}, {pipeline_mode = #tpu.pipeline_mode<synchronous>, transform_indices = @transform_6, window_bounds = array<i64: 1, 128>}, {transform_indices = @transform_7, window_bounds = array<i64: 8, 128>}]} {
    %c0 = arith.constant 0 : index
    %c0_0 = arith.constant 0 : index
    %0 = vector.load %arg1[%c0, %c0_0] : memref<8x400xf32, #tpu.memory_space<vmem>>, vector<8x400xf32>
    %1 = arith.truncf %0 : vector<8x400xf32> to vector<8x400xbf16>
    %c0_1 = arith.constant 0 : index
    %c0_2 = arith.constant 0 : index
    %2 = vector.load %arg2[%c0_1, %c0_2] : memref<400x128xbf16, #tpu.memory_space<vmem>>, vector<400x128xbf16>
    %cst = arith.constant dense<0.000000e+00> : vector<8x128xf32>
    %3 = tpu.matmul %1, %2, %cst {dimension_numbers = #tpu.dot_dimension_numbers<[1], [0], [0], [1], [0, 0, 1, 1], [], []>} : vector<8x400xbf16>, vector<400x128xbf16>, vector<8x128xf32> -> vector<8x128xf32>
    %c0_3 = arith.constant 0 : index
    %c0_4 = arith.constant 0 : index
    %4 = vector.load %arg3[%c0_3, %c0_4] : memref<1x128xf32, #tpu.memory_space<vmem>>, vector<1x128xf32>
    %5 = vector.broadcast %4 : vector<1x128xf32> to vector<8x128xf32>
    %6 = arith.addf %3, %5 : vector<8x128xf32>
    %cst_5 = arith.constant 0.000000e+00 : f32
    %7 = vector.broadcast %cst_5 : f32 to vector<8x128xf32>
    %8 = arith.maximumf %6, %7 : vector<8x128xf32>
    %9 = arith.truncf %8 : vector<8x128xf32> to vector<8x128xbf16>
    %c0_6 = arith.constant 0 : index
    %c0_7 = arith.constant 0 : index
    %10 = vector.load %arg4[%c0_6, %c0_7] : memref<128x128xbf16, #tpu.memory_space<vmem>>, vector<128x128xbf16>
    %cst_8 = arith.constant dense<0.000000e+00> : vector<8x128xf32>
    %11 = tpu.matmul %9, %10, %cst_8 {dimension_numbers = #tpu.dot_dimension_numbers<[1], [0], [0], [1], [0, 0, 1, 1], [], []>} : vector<8x128xbf16>, vector<128x128xbf16>, vector<8x128xf32> -> vector<8x128xf32>
    %c0_9 = arith.constant 0 : index
    %c0_10 = arith.constant 0 : index
    %12 = vector.load %arg5[%c0_9, %c0_10] : memref<1x128xf32, #tpu.memory_space<vmem>>, vector<1x128xf32>
    %13 = vector.broadcast %12 : vector<1x128xf32> to vector<8x128xf32>
    %14 = arith.addf %11, %13 : vector<8x128xf32>
    %cst_11 = arith.constant 0.000000e+00 : f32
    %15 = vector.broadcast %cst_11 : f32 to vector<8x128xf32>
    %16 = arith.maximumf %14, %15 : vector<8x128xf32>
    %17 = arith.truncf %16 : vector<8x128xf32> to vector<8x128xbf16>
    %c0_12 = arith.constant 0 : index
    %c0_13 = arith.constant 0 : index
    %18 = vector.load %arg6[%c0_12, %c0_13] : memref<128x128xbf16, #tpu.memory_space<vmem>>, vector<128x128xbf16>
    %cst_14 = arith.constant dense<0.000000e+00> : vector<8x128xf32>
    %19 = tpu.matmul %17, %18, %cst_14 {dimension_numbers = #tpu.dot_dimension_numbers<[1], [0], [0], [1], [0, 0, 1, 1], [], []>} : vector<8x128xbf16>, vector<128x128xbf16>, vector<8x128xf32> -> vector<8x128xf32>
    %c0_15 = arith.constant 0 : index
    %c0_16 = arith.constant 0 : index
    %20 = vector.load %arg7[%c0_15, %c0_16] : memref<1x128xf32, #tpu.memory_space<vmem>>, vector<1x128xf32>
    %21 = vector.broadcast %20 : vector<1x128xf32> to vector<8x128xf32>
    %22 = arith.addf %19, %21 : vector<8x128xf32>
    %c0_17 = arith.constant 0 : index
    %c0_18 = arith.constant 0 : index
    %23 = vector.load %arg8[%c0_17, %c0_18] : memref<8x128xf32, #tpu.memory_space<vmem>>, vector<8x128xf32>
    tpu.vector_store %arg8[%c0_17, %c0_18], %22 {strides = array<i32>} : memref<8x128xf32, #tpu.memory_space<vmem>>, vector<8x128xf32>,
    return
  }
  func.func @transform_0(%arg0: i32) -> (i32, i32) {
    %c0_i32 = arith.constant 0 : i32
    %c0_i32_0 = arith.constant 0 : i32
    return %arg0, %c0_i32 : i32, i32
  }
  func.func @transform_1(%arg0: i32) -> (i32, i32) {
    %c0_i32 = arith.constant 0 : i32
    %c0_i32_0 = arith.constant 0 : i32
    %c0_i32_1 = arith.constant 0 : i32
    return %c0_i32, %c0_i32_0 : i32, i32
  }
  func.func @transform_2(%arg0: i32) -> (i32, i32) {
    %c0_i32 = arith.constant 0 : i32
    %c0_i32_0 = arith.constant 0 : i32
    %c0_i32_1 = arith.constant 0 : i32
    return %c0_i32, %c0_i32_0 : i32, i32
  }
  func.func @transform_3(%arg0: i32) -> (i32, i32) {
    %c0_i32 = arith.constant 0 : i32
    %c0_i32_0 = arith.constant 0 : i32
    %c0_i32_1 = arith.constant 0 : i32
    return %c0_i32, %c0_i32_0 : i32, i32
  }
  func.func @transform_4(%arg0: i32) -> (i32, i32) {
    %c0_i32 = arith.constant 0 : i32
    %c0_i32_0 = arith.constant 0 : i32
    %c0_i32_1 = arith.constant 0 : i32
    return %c0_i32, %c0_i32_0 : i32, i32
  }
  func.func @transform_5(%arg0: i32) -> (i32, i32) {
    %c0_i32 = arith.constant 0 : i32
    %c0_i32_0 = arith.constant 0 : i32
    %c0_i32_1 = arith.constant 0 : i32
    return %c0_i32, %c0_i32_0 : i32, i32
  }
  func.func @transform_6(%arg0: i32) -> (i32, i32) {
    %c0_i32 = arith.constant 0 : i32
    %c0_i32_0 = arith.constant 0 : i32
    %c0_i32_1 = arith.constant 0 : i32
    return %c0_i32, %c0_i32_0 : i32, i32
  }
  func.func @transform_7(%arg0: i32) -> (i32, i32) {
    %c0_i32 = arith.constant 0 : i32
    %c0_i32_0 = arith.constant 0 : i32
    return %arg0, %c0_i32 : i32, i32
  }
}

</mosaic_0001>

<bundles_post_ra>
// kernel: cifar_server_forward.1
= control target key start
LH: loop header
LB: loop body
LE: loop exit
PB: predicated region body
PF: predicated region fallthrough
CT: control target
= control target key end

     0   :  { %12 = vsyncpa [#allocation3], 0  ;;  %s1154_s0 = inlined_call_operand.vmem [shape: f32[2,400], index: 0, kind: input, shape index: {}]   ;;  %s1155_s1 = inlined_call_operand.hbm [shape: bf16[400,128], index: 1, kind: input, shape index: {}]   ;;  %s1156_s2 = inlined_call_operand.hbm [shape: f32[1,128], index: 2, kind: input, shape index: {}]   ;;  %s1157_s3 = inlined_call_operand.hbm [shape: bf16[128,128], index: 3, kind: input, shape index: {}]   ;;  %s1158_s4 = inlined_call_operand.vmem [shape: f32[1,128], index: 4, kind: input, shape index: {}]   ;;  %s1159_s5 = inlined_call_operand.hbm [shape: bf16[128,128], index: 5, kind: input, shape index: {}]   ;;  %s1160_s6 = inlined_call_operand.vmem [shape: f32[1,128], index: 6, kind: input, shape index: {}]   ;;  %s1161_s7 = inlined_call_operand.hbm [shape: f32[2,128], index: 7, kind: output, shape index: {}]  }
   0x1   :  { %13 = vsyncpa [#allocation6], 0 }
   0x2   :  { %14 = vsyncpa [#allocation9], 0 }
   0x3   :  { %15 = vsyncpa [#allocation4], 0  ;;  %s973_s24 = smov [#allocation5]   ;;  %s974_s26 = smov [#allocation2]  }
   0x4   :  { %s36_s25 = sshll.u32 %s973_s24, 4  ;;  %s23_s27 = sshll.u32 %s974_s26, 4  ;;  %s37_s25 = int_to_ptr.vmem [resolvable:$true] %s36_s25  ;;  %s1026_s27 = int_to_ptr.vmem [resolvable:$true] %s23_s27 }
   0x5   :  { %s855_s30 = scalar_lea.hbm %s1156_s2, 16 }
   0x6   :  { %p856_p0 = scmp.ne.s32.totalorder %s1156_s2, %s855_s30  ;;  %p859_p1 = scmp.lt.u32.totalorder %s855_s30, %s1156_s2 }
   0x8   :  { %p861_p2 = pnand %p859_p1, %p856_p0 }
   0xa   :  { %864 = shalt.err (!%p861_p2)
}
   0xb   :  { %s865_s12 = scalar_lea.vmem %s37_s25, 16  ;;  %s869_s13 = scalar_lea.vmem %s37_s25, 32 }
   0xc   :  { %p866_p3 = scmp.ne.s32.totalorder %s37_s25, %s865_s12  ;;  %p870_p4 = scmp.lt.s32.totalorder %s37_s25, %s37_s25 }
   0xd   :  { %p871_p5 = scmp.lt.s32.totalorder %s869_s13, %s865_s12 }
   0xf   :  { %p872_p6 = por %p871_p5, %p870_p4 }
  0x11   :  { %p873_p7 = pnand %p872_p6, %p866_p3 }
  0x13   :  { %876 = shalt.err (!%p873_p7)
}
  0x14   :  { %39 = dma.hbm_to_vmem [thread:$0]  %s1156_s2, 16, %s37_s25, [#allocation6]  }
  0x15   :  { %s877_s18 = scalar_lea.hbm %s1155_s1, 3200 }
  0x16   :  { %p878_p8 = scmp.ne.s32.totalorder %s1155_s1, %s877_s18  ;;  %p881_p9 = scmp.lt.u32.totalorder %s877_s18, %s1155_s1 }
  0x18   :  { %p883_p10 = pnand %p881_p9, %p878_p8 }
  0x1a   :  { %886 = shalt.err (!%p883_p10)
}
  0x1b   :  { %s887_s23 = scalar_lea.vmem %s1026_s27, 3200  ;;  %p892_p12 = scmp.lt.s32.totalorder %s1026_s27, %s1026_s27 }
  0x1c   :  { %p888_p11 = scmp.ne.s32.totalorder %s1026_s27, %s887_s23  ;;  %p893_p13 = scmp.lt.s32.totalorder %s887_s23, %s887_s23 }
  0x1e   :  { %p894_p0 = por %p893_p13, %p892_p12 }
  0x20   :  { %p895_p1 = pnand %p894_p0, %p888_p11 }
  0x22   :  { %898 = shalt.err (!%p895_p1)
}
  0x23   :  { %s975_s2 = smov 64   ;;  %s976_s24 = smov 4  }
  0x24   :  { %29 = dma.hbm_to_vmem [thread:$0]  %s1155_s1, 3200, %s1026_s27, [#allocation3], %s975_s2, %s975_s2, %s976_s24  }
  0x25   :  { %s977_s28 = smov [#allocation7]   ;;  %s978_s30 = smov [#allocation8]  }
  0x26   :  { %s45_s29 = sshll.u32 %s977_s28, 4  ;;  %s59_s8 = sshll.u32 %s978_s30, 4  ;;  %s46_s29 = int_to_ptr.vmem [resolvable:$true] %s45_s29  ;;  %s1060_s8 = int_to_ptr.vmem [resolvable:$true] %s59_s8 }
  0x27   :  { %s899_s11 = scalar_lea.hbm %s1157_s3, 1024 }
  0x28   :  { %p900_p2 = scmp.ne.s32.totalorder %s1157_s3, %s899_s11  ;;  %p903_p3 = scmp.lt.u32.totalorder %s899_s11, %s1157_s3 }
  0x2a   :  { %p905_p4 = pnand %p903_p3, %p900_p2 }
  0x2c   :  { %908 = shalt.err (!%p905_p4)
}
  0x2d   :  { %s909_s1 = scalar_lea.vmem %s46_s29, 1024  ;;  %p914_p6 = scmp.lt.s32.totalorder %s46_s29, %s46_s29 }
  0x2e   :  { %p910_p5 = scmp.ne.s32.totalorder %s46_s29, %s909_s1  ;;  %p915_p7 = scmp.lt.s32.totalorder %s909_s1, %s909_s1 }
  0x30   :  { %p916_p8 = por %p915_p7, %p914_p6 }
  0x32   :  { %p917_p9 = pnand %p916_p8, %p910_p5 }
  0x34   :  { %920 = shalt.err (!%p917_p9)
}
  0x35   :  { %51 = dma.hbm_to_vmem [thread:$0]  %s1157_s3, 1024, %s46_s29, [#allocation6], %s975_s2, %s975_s2, %s976_s24  }
  0x36   :  { %s921_s19 = scalar_lea.hbm %s1159_s5, 1024 }
  0x37   :  { %p922_p10 = scmp.ne.s32.totalorder %s1159_s5, %s921_s19  ;;  %p925_p11 = scmp.lt.u32.totalorder %s921_s19, %s1159_s5 }
  0x39   :  { %p927_p12 = pnand %p925_p11, %p922_p10 }
  0x3b   :  { %930 = shalt.err (!%p927_p12)
}
  0x3c   :  { %s931_s25 = scalar_lea.vmem %s1060_s8, 1024  ;;  %p936_p0 = scmp.lt.s32.totalorder %s1060_s8, %s1060_s8 }
  0x3d   :  { %p932_p13 = scmp.ne.s32.totalorder %s1060_s8, %s931_s25  ;;  %p937_p1 = scmp.lt.s32.totalorder %s931_s25, %s931_s25 }
  0x3f   :  { %p938_p2 = por %p937_p1, %p936_p0 }
  0x41   :  { %p939_p3 = pnand %p938_p2, %p932_p13 }
  0x43   :  { %942 = shalt.err (!%p939_p3)
}
  0x44   :  { %65 = dma.hbm_to_vmem [thread:$0]  %s1159_s5, 1024, %s1060_s8, [#allocation9], %s975_s2, %s975_s2, %s976_s24  }
  0x45   :  { %965 = dma.done.wait [#allocation3], 3200  }
  0x46   :  { %966 = vsyncadd [#allocation3], 4294964096 }
  0x47   :  { %967 = dma.done.wait [#allocation6], 1040  }
  0x48   :  { %968 = vsyncadd [#allocation6], 4294966256 }
  0x49   :  { %969 = dma.done.wait [#allocation9], 1024  }
  0x4a   :  { %970 = vsyncadd [#allocation9], 4294966272  ;;  %v979_v0 = vmov 0   ;;  %v808_v1 = vld [vmem:[#allocation2 + $0x40] sm:$0xff]   ;;  %v811_v4 = vld [vmem:[#allocation2 + $0x48] sm:$0xff]   ;;  %v96_v17 = vlaneseq  ;;  %vm340_vm0 = vcmask 130048  }
  0x4b   :  { %384 = vmatprep.subr.bf16.mxu1 %v979_v0  ;;  %v809_v2 = vld [vmem:[#allocation2 + $0x80] sm:$0xff]   ;;  %715 = vmatprep.subr.bf16.mxu0 %v808_v1  ;;  %v812_v5 = vld [vmem:[#allocation2 + $0x88] sm:$0xff]   ;;  %v814_v7 = vld [vmem:[#allocation2 + $0x50] sm:$0xff]   ;;  %v980_v15 = vmov 1983009808   ;;  %v981_v48 = vmov 0.0  }
  0x4c   :  { %v810_v3 = vld [vmem:[#allocation2] sm:$0xff]   ;;  %385 = vmatpush1.bf16.msra.mxu1 %v809_v2  ;;  %v813_v6 = vld [vmem:[#allocation2 + $0x8] sm:$0xff]   ;;  %v815_v8 = vld [vmem:[#allocation2 + $0x90] sm:$0xff]   ;;  %v94_v16 = vunpack.c.l.s4 %v980_v15  ;;  %v97_v23 = vshrl.u32 %v96_v17, 7  ;;  %vm982_vm1 = vmmov 0  }
  0x4d   :  { %716 = vmatpush3.bf16.msra.mxu0 %v810_v3  ;;  %386 = vmatprep.subr.bf16.mxu1 %v979_v0  ;;  %v816_v9 = vld [vmem:[#allocation2 + $0x10] sm:$0xff]   ;;  %v817_v10 = vld [vmem:[#allocation2 + $0x58] sm:$0xff]   ;;  %v820_v13 = vld [vmem:[#allocation2 + $0x60] sm:$0xff]  }
  0x4e   :  { %717 = vmatprep.subr.bf16.mxu0 %v811_v4  ;;  %v818_v11 = vld [vmem:[#allocation2 + $0x98] sm:$0xff]   ;;  %v821_v14 = vld [vmem:[#allocation2 + $0xa0] sm:$0xff]   ;;  %v823_v19 = vld [vmem:[#allocation2 + $0x68] sm:$0xff]   ;;  %v95_v22 = vunpack.c.0.s8 %v94_v16 }
  0x4f   :  { %v819_v12 = vld [vmem:[#allocation2 + $0x18] sm:$0xff]   ;;  %v822_v18 = vld [vmem:[#allocation2 + $0x20] sm:$0xff]   ;;  %v824_v20 = vld [vmem:[#allocation2 + $0xa8] sm:$0xff]  }
  0x50   :  { %387 = vmatpush1.bf16.msra.mxu1 %v812_v5  ;;  %v825_v21 = vld [vmem:[#allocation2 + $0x28] sm:$0xff]   ;;  %v826_v24 = vld [vmem:[#allocation2 + $0x70] sm:$0xff]   ;;  %v829_v27 = vld [vmem:[#allocation2 + $0x78] sm:$0xff]   ;;  %v98_v28 = vsub.s32 %v95_v22, %v97_v23 }
  0x51   :  { %718 = vmatpush3.bf16.msra.mxu0 %v813_v6  ;;  %388 = vmatprep.subr.bf16.mxu1 %v979_v0  ;;  %v827_v25 = vld [vmem:[#allocation2 + $0xb0] sm:$0xff]   ;;  %v832_v29 = vld [vmem:[%s1154_s0] ss:$8 sps:$4 sm:$0xff]   ;;  %v837_v34 = vld [vmem:[%s1154_s0 + $0x4] ss:$8 sps:$4 sm:$0xff]  }
  0x52   :  { %719 = vmatprep.subr.bf16.mxu0 %v814_v7  ;;  %v828_v26 = vld [vmem:[#allocation2 + $0x30] sm:$0xff]   ;;  %v830_v31 = vld [vmem:[#allocation2 + $0xb8] sm:$0xff]   ;;  %v99_v32 = vrot.slane %v832_v29, %v98_v28  ;;  %v106_v39 = vrot.slane %v837_v34, %v98_v28  ;;  %v836_v43 = vld [vmem:[#allocation2 + $0xc0] sm:$0xff]  }
  0x53   :  { %v834_v30 = vld [vmem:[%s1154_s0 + $0x10] ss:$8 sps:$4 sm:$0xff]   ;;  %v838_v35 = vld [vmem:[%s1154_s0 + $0x14] ss:$8 sps:$4 sm:$0xff]   ;;  %v831_v36 = vld [vmem:[#allocation2 + $0x38] sm:$0xff]  }
  0x54   :  { %389 = vmatpush1.bf16.msra.mxu1 %v815_v8  ;;  %v113_v33 = vrot.slane %v834_v30, %v98_v28  ;;  %v120_v40 = vrot.slane %v838_v35, %v98_v28  ;;  %v839_v46 = vld [vmem:[#allocation7] sm:$0xff]   ;;  %v840_v50 = vld [vmem:[#allocation7 + $0x8] sm:$0xff]   ;;  %v841_v51 = vld [vmem:[#allocation7 + $0x10] sm:$0xff]  }
  0x55   :  { %720 = vmatpush3.bf16.msra.mxu0 %v816_v9  ;;  %390 = vmatprep.subr.bf16.mxu1 %v979_v0  ;;  %v842_v52 = vld [vmem:[#allocation7 + $0x18] sm:$0xff]   ;;  %v843_v53 = vld [vmem:[#allocation7 + $0x20] sm:$0xff]   ;;  %v844_v54 = vld [vmem:[#allocation7 + $0x28] sm:$0xff]  }
  0x56   :  { %721 = vmatprep.subr.bf16.mxu0 %v817_v10  ;;  %v122_v37 = vcombine.high %v99_v32, %v113_v33  ;;  %v121_v38 = vcombine.low %v99_v32, %v113_v33  ;;  %v124_v44 = vcombine.high %v106_v39, %v120_v40  ;;  %v123_v45 = vcombine.low %v106_v39, %v120_v40  ;;  %v845_v55 = vld [vmem:[#allocation7 + $0x30] sm:$0xff]   ;;  %v846_v56 = vld [vmem:[#allocation7 + $0x38] sm:$0xff]   ;;  %v847_v57 = vld [vmem:[#allocation8] sm:$0xff]  }
  0x57   :  { %v848_v58 = vld [vmem:[#allocation8 + $0x8] sm:$0xff]   ;;  %v849_v59 = vld [vmem:[#allocation8 + $0x10] sm:$0xff]   ;;  %v850_v60 = vld [vmem:[#allocation8 + $0x18] sm:$0xff]  }
  0x58   :  { %391 = vmatpush1.bf16.msra.mxu1 %v818_v11  ;;  %v130_v41 = vpack.c.bf16 %v122_v37, %v122_v37  ;;  %v129_v42 = vpack.c.bf16 %v121_v38, %v121_v38  ;;  %v132_v47 = vpack.c.bf16 %v124_v44, %v124_v44  ;;  %v131_v49 = vpack.c.bf16 %v123_v45, %v123_v45  ;;  %v851_v61 = vld [vmem:[#allocation8 + $0x20] sm:$0xff]   ;;  %v852_v62 = vld [vmem:[#allocation8 + $0x28] sm:$0xff]   ;;  %v670_v1 = vld [vmem:[#allocation5] ss:$0 sm:$0xff] }
  0x59   :  { %722 = vmatpush3.bf16.msra.mxu0 %v819_v12  ;;  %392 = vmatprep.subr.bf16.mxu1 %v979_v0  ;;  %v697_v15 = vld [vmem:[%s1158_s4] ss:$0 sm:$0xff] }
  0x5a   :  { %723 = vmatprep.subr.bf16.mxu0 %v820_v13  ;;  %376 = vmatprep.mubr.bf16.mxu0 %v130_v41  ;;  %v853_v13 = vld [vmem:[#allocation8 + $0x30] sm:$0xff]   ;;  %v706_v23 = vld [vmem:[%s1160_s6] ss:$0 sm:$0xff] }
  0x5b   :  { %696 = vmatprep.mubr.msk.bf16.mxu1 %vm340_vm0, %v132_v47 }
  0x5c   :  { %393 = vmatpush1.bf16.msra.mxu1 %v821_v14  ;;  %v854_v14 = vld [vmem:[#allocation8 + $0x38] sm:$0xff]  }
  0x5d   :  { %724 = vmatpush3.bf16.msra.mxu0 %v822_v18  ;;  %394 = vmatprep.subr.bf16.mxu1 %v979_v0 }
  0x5e   :  { %725 = vmatprep.subr.bf16.mxu0 %v823_v19 }
  0x60   :  { %395 = vmatpush1.bf16.msra.mxu1 %v824_v20 }
  0x61   :  { %726 = vmatpush3.bf16.msra.mxu0 %v825_v21  ;;  %396 = vmatprep.subr.bf16.mxu1 %v979_v0 }
  0x62   :  { %727 = vmatprep.subr.bf16.mxu0 %v826_v24 }
  0x64   :  { %397 = vmatpush1.bf16.msra.mxu1 %v827_v25 }
  0x65   :  { %728 = vmatpush3.bf16.msra.mxu0 %v828_v26  ;;  %398 = vmatprep.subr.bf16.mxu1 %v979_v0 }
  0x66   :  { %729 = vmatprep.subr.bf16.mxu0 %v829_v27 }
  0x68   :  { %399 = vmatpush1.bf16.msra.mxu1 %v830_v31 }
  0x69   :  { %730 = vmatpush3.bf16.msra.mxu0 %v831_v36  ;;  %400 = vmatprep.subr.bf16.mxu1 %v979_v0 }
  0x6a   :  { %755 = vmatprep.subr.bf16.mxu0 %v981_v48 }
  0x6c   :  { %377 = vmatmul.mubr.bf16.vlgmr.msra.gmra.mrb[0].mxu0 %v129_v42  ;;  %401 = vmatpush1.bf16.msra.mxu1 %v836_v43 }
  0x6d   :  { %756 = vmatpush3.bf16.msra.mxu0 %v839_v46  ;;  %775 = vmatprep.subr.bf16.mxu1 %v981_v48 }
  0x6e   :  { %757 = vmatprep.subr.bf16.mxu0 %v981_v48  ;;  %771 = vmatprep.mubr.msk.bf16.mxu0 %vm982_vm1, %v981_v48 }
  0x6f   :  { %417 = vmatmul.mubr.bf16.vlgmr.msra.gmra.mrb[0].mxu1 %v131_v49 }
  0x70   :  { %791 = vmatprep.mubr.msk.bf16.mxu1 %vm982_vm1, %v981_v48  ;;  %776 = vmatpush3.bf16.msra.mxu1 %v847_v57 }
  0x71   :  { %758 = vmatpush3.bf16.msra.mxu0 %v840_v50  ;;  %777 = vmatprep.subr.bf16.mxu1 %v981_v48 }
  0x72   :  { %759 = vmatprep.subr.bf16.mxu0 %v981_v48 }
  0x74   :  { %778 = vmatpush3.bf16.msra.mxu1 %v848_v58 }
  0x75   :  { %760 = vmatpush3.bf16.msra.mxu0 %v841_v51  ;;  %779 = vmatprep.subr.bf16.mxu1 %v981_v48 }
  0x76   :  { %761 = vmatprep.subr.bf16.mxu0 %v981_v48 }
  0x78   :  { %780 = vmatpush3.bf16.msra.mxu1 %v849_v59 }
  0x79   :  { %762 = vmatpush3.bf16.msra.mxu0 %v842_v52  ;;  %781 = vmatprep.subr.bf16.mxu1 %v981_v48 }
  0x7a   :  { %763 = vmatprep.subr.bf16.mxu0 %v981_v48 }
  0x7c   :  { %782 = vmatpush3.bf16.msra.mxu1 %v850_v60 }
  0x7d   :  { %764 = vmatpush3.bf16.msra.mxu0 %v843_v53  ;;  %783 = vmatprep.subr.bf16.mxu1 %v981_v48 }
  0x7e   :  { %765 = vmatprep.subr.bf16.mxu0 %v981_v48 }
  0x80   :  { %784 = vmatpush3.bf16.msra.mxu1 %v851_v61 }
  0x81   :  { %766 = vmatpush3.bf16.msra.mxu0 %v844_v54  ;;  %785 = vmatprep.subr.bf16.mxu1 %v981_v48 }
  0x82   :  { %767 = vmatprep.subr.bf16.mxu0 %v981_v48 }
  0x84   :  { %786 = vmatpush3.bf16.msra.mxu1 %v852_v62 }
  0x85   :  { %768 = vmatpush3.bf16.msra.mxu0 %v845_v55  ;;  %787 = vmatprep.subr.bf16.mxu1 %v981_v48 }
  0x86   :  { %769 = vmatprep.subr.bf16.mxu0 %v981_v48 }
  0x88   :  { %788 = vmatpush3.bf16.msra.mxu1 %v853_v13 }
  0x89   :  { %770 = vmatpush3.bf16.msra.mxu0 %v846_v56  ;;  %789 = vmatprep.subr.bf16.mxu1 %v981_v48 }
  0x8c   :  { %790 = vmatpush3.bf16.msra.mxu1 %v854_v14 }
 0x13f   :  { %v731_v63 = vpop.f32.mrb[0].mxu0 }
 0x140   :  { %v732_v0 = vpop.f32.mrb[1].mxu0 }
 0x141   :  { %v733_v2 = vadd.f32 %v732_v0, %v731_v63  ;;  %v734_v3 = vpop.f32.mrb[2].mxu0 }
 0x142   :  { %v735_v4 = vpop.f32.mrb[3].mxu0  ;;  %v418_v5 = vpop.f32.mrb[0].mxu1 }
 0x143   :  { %v379_v6 = vadd.f32 %v733_v2, %v670_v1  ;;  %v420_v7 = vpop.f32.mrb[1].mxu1 }
 0x144   :  { %v421_v8 = vpop.f32.mrb[2].mxu1 }
 0x145   :  { %v419_v9 = vadd.f32 %v418_v5, %v379_v6  ;;  %v422_v10 = vpop.f32.mrb[3].mxu1 }
 0x147   :  { %v424_v11 = vmax.f32 %v419_v9, 0.0 }
 0x149   :  { %v425_v12 = vpack.c.bf16 %v424_v11, %v424_v11 }
 0x14b   :  { %772 = vmatmul.mubr.bf16.vlgmr.msra.gmra.mrb[4].mxu0 %v425_v12 }
 0x21e   :  { %v531_v16 = vpop.f32.mrb[4].mxu0 }
 0x21f   :  { %v532_v17 = vadd.f32 %v697_v15, %v531_v16  ;;  %v773_v18 = vpop.f32.mrb[5].mxu0 }
 0x220   :  { %v534_v19 = vpop.f32.mrb[6].mxu0 }
 0x221   :  { %v537_v20 = vmax.f32 %v532_v17, 0.0  ;;  %v774_v21 = vpop.f32.mrb[7].mxu0 }
 0x223   :  { %v538_v22 = vpack.c.bf16 %v537_v20, %v537_v20 }
 0x225   :  { %792 = vmatmul.mubr.bf16.vlgmr.msra.gmra.mrb[4].mxu1 %v538_v22 }
 0x2f8   :  { %v644_v24 = vpop.f32.mrb[4].mxu1 }
 0x2f9   :  { %v645_v25 = vadd.f32 %v706_v23, %v644_v24  ;;  %v793_v26 = vpop.f32.mrb[5].mxu1 }
 0x2fa   :  { %v647_v27 = vpop.f32.mrb[6].mxu1 }
 0x2fb   :  { %650 = vst [vmem:[#allocation10] sm:$0xff] %v645_v25  ;;  %v794_v28 = vpop.f32.mrb[7].mxu1 }
 0x2fc   :  { %655 = vsyncadd [#allocation4], 96  ;;  %s983_s4 = smov [#allocation10]  }
 0x2fd   :  { %s656_s13 = sshll.u32 %s983_s4, 4  ;;  %s657_s13 = int_to_ptr.vmem [resolvable:$true] %s656_s13 }
 0x2fe   :  { %s943_s14 = scalar_lea.vmem %s657_s13, 32  ;;  %s947_s15 = scalar_lea.vmem %s657_s13, 128 }
 0x2ff   :  { %p944_p4 = scmp.ne.s32.totalorder %s657_s13, %s943_s14  ;;  %p948_p5 = scmp.lt.s32.totalorder %s657_s13, %s657_s13 }
 0x300   :  { %p949_p6 = scmp.lt.s32.totalorder %s947_s15, %s943_s14 }
 0x302   :  { %p950_p7 = por %p949_p6, %p948_p5 }
 0x304   :  { %p951_p8 = pnand %p950_p7, %p944_p4 }
 0x306   :  { %954 = shalt.err (!%p951_p8)
}
 0x307   :  { %s955_s27 = scalar_lea.hbm %s1161_s7, 32 }
 0x308   :  { %p956_p9 = scmp.ne.s32.totalorder %s1161_s7, %s955_s27  ;;  %p959_p10 = scmp.lt.u32.totalorder %s955_s27, %s1161_s7 }
 0x30a   :  { %p961_p11 = pnand %p959_p10, %p956_p9 }
 0x30c   :  { %964 = shalt.err (!%p961_p11)
}
 0x30d   :  { %s984_s20 = smov 32   ;;  %s985_s21 = smov 2  }
 0x30e   :  { %662 = dma.vmem_to_hbm [thread:$0]  %s657_s13, 32, %s1161_s7, [#allocation4], %s984_s20, %s984_s20, %s985_s21  }
 0x30f   :  { %971 = dma.done.wait [#allocation4], 128  }
 0x310   :  { %972 = vsyncadd [#allocation4], 4294967168 }
 0x311   :  { %666 = vsyncpa [#allocation3], 1 }
 0x312   :  { %667 = vsyncpa [#allocation6], 1 }
 0x313   :  { %668 = vsyncpa [#allocation9], 1 }
 0x314   :  { %669 = vsyncpa [#allocation4], 1 }

</bundles_post_ra>
